<compile_context>
chip_gen: v5e
topology: v5e:2x2
jax: 0.10.0
libtpu: 0.0.40
codegen_flags: <defaults>
</compile_context>

<pallas_src>
import functools

import jax
import jax.numpy as jnp
from jax.experimental import pallas as pl
from jax.experimental.pallas import tpu as pltpu

IN_FEATURES = 10
OUT_FEATURES = 25
LANE = 128
DEFAULT_TB = 16384     # batch lanes per grid step; f32 x+out tiles ~6 MiB double-buffered
MIN_SPLIT = 2 * LANE   # force >=2 tiles once each TC can get a full 128-lane tile (v7x)


def linear_kernel(x_ref, w_ref, b_ref, o_ref):
    # out_T(25, TB) = W(25, 10) @ x_T(10, TB) + b(25, 1); batch sits on the lane axis.
    x = x_ref[...]                       # (IN, TB)   lane-dense batch tile
    w = w_ref[...]                       # (OUT, IN)  resident, same block every step
    b = b_ref[...]                       # (OUT, 1)
    acc = jnp.dot(w, x, preferred_element_type=jnp.float32)   # MXU, f32 accumulate
    o_ref[...] = (acc + b).astype(o_ref.dtype)


def _round_up(v, m):
    return ((v + m - 1) // m) * m


@functools.partial(jax.jit, static_argnames=("tb",))
def net_forward(x, weight, bias, *, tb=DEFAULT_TB):
    """x: (B, 10) f32; weight: (25, 10) f32 (native PyTorch layout); bias: (25,) f32."""
    B = x.shape[0]

    # Tile the batch (lane) axis. Single small tile -> use the exact extent (legal: last
    # block dim == full array dim, no padding at all). Multi-tile -> balanced, 128-lane
    # aligned tiles; the ragged last tile is handled by Pallas OOB read/write clipping.
    n_tiles = pl.cdiv(B, tb)
    if n_tiles == 1 and B >= MIN_SPLIT:
        n_tiles = 2                       # let both v7x TensorCores work
    if n_tiles == 1:
        tb_eff = B
    else:
        tb_eff = _round_up(pl.cdiv(B, n_tiles), LANE)
        n_tiles = pl.cdiv(B, tb_eff)

    x_t = x.T                             # (IN, B): one transpose puts batch on lanes
    b2d = bias.reshape(OUT_FEATURES, 1)

    cost = pl.CostEstimate(
        flops=2 * B * IN_FEATURES * OUT_FEATURES,
        transcendentals=0,
        bytes_accessed=4 * (B * (IN_FEATURES + OUT_FEATURES)
                            + OUT_FEATURES * IN_FEATURES + OUT_FEATURES),
    )

    out_t = pl.pallas_call(
        linear_kernel,
        out_shape=jax.ShapeDtypeStruct((OUT_FEATURES, B), jnp.float32),
        grid=(n_tiles,),
        in_specs=[
            pl.BlockSpec((IN_FEATURES, tb_eff), lambda i: (0, i)),       # x_T tile
            pl.BlockSpec((OUT_FEATURES, IN_FEATURES), lambda i: (0, 0)),  # weight (resident)
            pl.BlockSpec((OUT_FEATURES, 1), lambda i: (0, 0)),            # bias (resident)
        ],
        out_specs=pl.BlockSpec((OUT_FEATURES, tb_eff), lambda i: (0, i)),
        compiler_params=pltpu.CompilerParams(
            dimension_semantics=("parallel",),   # shard batch tiles across TCs (v7x)
        ),
        cost_estimate=cost,
    )(x_t, weight, b2d)

    return out_t.T                        # back to (B, 25)


def init_params(key):
    # Matches Net._initialize_weights for nn.Linear:
    #   weight ~ Normal(0, 0.01) with PyTorch layout (out, in); bias = 0.
    weight = 0.01 * jax.random.normal(
        key, (OUT_FEATURES, IN_FEATURES), dtype=jnp.float32)
    bias = jnp.zeros((OUT_FEATURES,), dtype=jnp.float32)
    return weight, bias


if __name__ == "__main__":
    key = jax.random.PRNGKey(0)
    k_w, k_x1, k_x2, k_x3 = jax.random.split(key, 4)

    weight, bias = init_params(k_w)

    def reference(xs):
        return xs @ weight.T + bias

    # Small batch -> single exact tile.
    x1 = jax.random.normal(k_x1, (8, IN_FEATURES), dtype=jnp.float32)
    y1 = net_forward(x1, weight, bias)
    jax.block_until_ready(y1)
    assert y1.shape == (8, OUT_FEATURES)
    assert jnp.allclose(y1, reference(x1), atol=1e-5, rtol=1e-5)

    # Ragged batch (not a multiple of 8/128) -> still a single exact tile.
    x2 = jax.random.normal(k_x2, (13, IN_FEATURES), dtype=jnp.float32)
    y2 = net_forward(x2, weight, bias)
    jax.block_until_ready(y2)
    assert y2.shape == (13, OUT_FEATURES)
    assert jnp.allclose(y2, reference(x2), atol=1e-5, rtol=1e-5)

    # Moderate batch -> split into >=2 lane-aligned tiles with a ragged tail
    # (exercises the megacore split and OOB-clipped last block).
    x3 = jax.random.normal(k_x3, (300, IN_FEATURES), dtype=jnp.float32)
    y3 = net_forward(x3, weight, bias)
    jax.block_until_ready(y3)
    assert y3.shape == (300, OUT_FEATURES)
    assert jnp.allclose(y3, reference(x3), atol=1e-5, rtol=1e-5)

    # Same batch with a small tb to push several tiles through the streaming pipeline.
    y3b = net_forward(x3, weight, bias, tb=128)
    jax.block_until_ready(y3b)
    assert jnp.allclose(y3b, reference(x3), atol=1e-5, rtol=1e-5)

    print("KERNEL_OK")
</pallas_src>

<mosaic_0001>
module attributes {stable_mosaic.version = 11 : i64} {
  func.func @linear_kernel(%arg0: i32, %arg1: memref<10x8xf32, #tpu.memory_space<vmem>>, %arg2: memref<25x10xf32, #tpu.memory_space<vmem>>, %arg3: memref<25x1xf32, #tpu.memory_space<vmem>>, %arg4: memref<25x8xf32, #tpu.memory_space<vmem>>) attributes {dimension_semantics = [#tpu.dimension_semantics<parallel>], iteration_bounds = array<i64: 1>, scalar_prefetch = 0 : i64, scratch_operands = 0 : i64, tpu.core_type = #tpu.core_type<tc>, window_params = [{transform_indices = @transform_0, window_bounds = array<i64: 10, 8>}, {pipeline_mode = #tpu.pipeline_mode<synchronous>, transform_indices = @transform_1, window_bounds = array<i64: 25, 10>}, {pipeline_mode = #tpu.pipeline_mode<synchronous>, transform_indices = @transform_2, window_bounds = array<i64: 25, 1>}, {transform_indices = @transform_3, window_bounds = array<i64: 25, 8>}]} {
    %c0 = arith.constant 0 : index
    %c0_0 = arith.constant 0 : index
    %0 = vector.load %arg1[%c0, %c0_0] : memref<10x8xf32, #tpu.memory_space<vmem>>, vector<10x8xf32>
    %c0_1 = arith.constant 0 : index
    %c0_2 = arith.constant 0 : index
    %1 = vector.load %arg2[%c0_1, %c0_2] : memref<25x10xf32, #tpu.memory_space<vmem>>, vector<25x10xf32>
    %c0_3 = arith.constant 0 : index
    %c0_4 = arith.constant 0 : index
    %2 = vector.load %arg3[%c0_3, %c0_4] : memref<25x1xf32, #tpu.memory_space<vmem>>, vector<25x1xf32>
    %cst = arith.constant dense<0.000000e+00> : vector<25x8xf32>
    %3 = tpu.matmul %1, %0, %cst {dimension_numbers = #tpu.dot_dimension_numbers<[1], [0], [0], [1], [0, 0, 1, 1], [], []>} : vector<25x10xf32>, vector<10x8xf32>, vector<25x8xf32> -> vector<25x8xf32>
    %4 = vector.broadcast %2 : vector<25x1xf32> to vector<25x8xf32>
    %5 = arith.addf %3, %4 : vector<25x8xf32>
    %c0_5 = arith.constant 0 : index
    %c0_6 = arith.constant 0 : index
    %6 = vector.load %arg4[%c0_5, %c0_6] : memref<25x8xf32, #tpu.memory_space<vmem>>, vector<25x8xf32>
    tpu.vector_store %arg4[%c0_5, %c0_6], %5 {strides = array<i32>} : memref<25x8xf32, #tpu.memory_space<vmem>>, vector<25x8xf32>,
    return
  }
  func.func @transform_0(%arg0: i32) -> (i32, i32) {
    %c0_i32 = arith.constant 0 : i32
    %c0_i32_0 = arith.constant 0 : i32
    return %c0_i32, %arg0 : i32, i32
  }
  func.func @transform_1(%arg0: i32) -> (i32, i32) {
    %c0_i32 = arith.constant 0 : i32
    %c0_i32_0 = arith.constant 0 : i32
    %c0_i32_1 = arith.constant 0 : i32
    return %c0_i32, %c0_i32_0 : i32, i32
  }
  func.func @transform_2(%arg0: i32) -> (i32, i32) {
    %c0_i32 = arith.constant 0 : i32
    %c0_i32_0 = arith.constant 0 : i32
    %c0_i32_1 = arith.constant 0 : i32
    return %c0_i32, %c0_i32_0 : i32, i32
  }
  func.func @transform_3(%arg0: i32) -> (i32, i32) {
    %c0_i32 = arith.constant 0 : i32
    %c0_i32_0 = arith.constant 0 : i32
    return %c0_i32, %arg0 : i32, i32
  }
}

</mosaic_0001>

<bundles_post_ra>
// kernel: net_forward.1
= control target key start
LH: loop header
LB: loop body
LE: loop exit
PB: predicated region body
PF: predicated region fallthrough
CT: control target
= control target key end

     0   :  { %vm57_vm0 = vcmask 1041408   ;;  %v114_v2 = vmov 0   ;;  %vm44_vm1 = vcmask 80896   ;;  %vm90_vm2 = vcmask 64512   ;;  %s177_s0 = inlined_call_operand.vmem [shape: f32[10,8], index: 0, kind: input, shape index: {}]   ;;  %s178_s1 = inlined_call_operand.vmem [shape: f32[25,10], index: 1, kind: input, shape index: {}]   ;;  %s179_s2 = inlined_call_operand.vmem [shape: f32[25,1], index: 2, kind: input, shape index: {}]   ;;  %s180_s3 = inlined_call_operand.vmem [shape: f32[25,8], index: 3, kind: output, shape index: {}]  }
   0x1   :  { %v15_v0 = vld [vmem:[%s177_s0 + $0x8] sm:$0x3]  ;;  %v14_v1 = vld [vmem:[%s177_s0] sm:$0xff]  ;;  %113 = vset.pattern.permute.xlu1 %v114_v2  ;;  %112 = vset.pattern.permute.xlu0 %v114_v2  ;;  %v18_v5 = vld [vmem:[%s178_s1 + $0x10] sm:$0xff]  ;;  %vm94_vm3 = vcmask 57344  }
   0x2   :  { %100 = vmatpush.msk.msra.mxu0 %vm57_vm0, %v15_v0  ;;  %105 = vmatpush.msk.msra.mxu1 %vm57_vm0, %v15_v0  ;;  %v16_v3 = vld [vmem:[%s178_s1] sm:$0xff]  ;;  %v17_v4 = vld [vmem:[%s178_s1 + $0x8] sm:$0xff]  ;;  %v19_v6 = vld [vmem:[%s178_s1 + $0x18] sm:$0x1] }
   0x3   :  { %106 = vmatpush.msk.msra.mxu2 %vm57_vm0, %v15_v0  ;;  %107 = vmatpush.msk.msra.mxu3 %vm57_vm0, %v15_v0  ;;  %v22_v7 = vld [vmem:[%s179_s2 + $0x10] sm:$0xff]  ;;  %v20_v8 = vld [vmem:[%s179_s2] sm:$0xff]  ;;  %v23_v9 = vld [vmem:[%s179_s2 + $0x18] sm:$0x1] }
   0x4   :  { %76 = vmatpush.msra.mxu0 %v14_v1  ;;  %108 = vmatpush.msra.mxu1 %v14_v1  ;;  %v21_v10 = vld [vmem:[%s179_s2 + $0x8] sm:$0xff] }
   0x5   :  { %109 = vmatpush.msra.mxu2 %v14_v1  ;;  %110 = vmatpush.msra.mxu3 %v14_v1 }
   0x6   :  { %101 = vmatmul.msk.f32.vlgmr.msra.gmra.mxu0 %vm44_vm1, %v16_v3  ;;  %102 = vmatmul.msk.f32.vlgmr.msra.gmra.mxu1 %vm44_vm1, %v17_v4 }
   0x7   :  { %103 = vmatmul.msk.f32.vlgmr.msra.gmra.mxu2 %vm44_vm1, %v18_v5  ;;  %104 = vmatmul.msk.f32.vlgmr.msra.gmra.mxu3 %vm44_vm1, %v19_v6 }
   0x8   :  { %36 = vperm.xlu1 %113, %v22_v7   ;;  %26 = vperm.xlu0 %112, %v20_v8  }
  0x10   :  { %41 = vperm.xlu1 %113, %v23_v9   ;;  %31 = vperm.xlu0 %112, %v21_v10  }
  0x7a   :  { %v27_v11 = vpop.permute.xlu0 %26  ;;  %v37_v12 = vpop.permute.xlu1 %36 }
  0x82   :  { %v32_v13 = vpop.permute.xlu0 %31  ;;  %v42_v18 = vpop.permute.xlu1 %41 }
  0x83   :  { %v78_v14 = vpop.f32.mrf.mxu0  ;;  %v81_v15 = vpop.f32.mrf.mxu1 }
  0x84   :  { %v79_v16 = vadd.f32 %v78_v14, %v27_v11  ;;  %v82_v17 = vadd.f32 %v81_v15, %v32_v13 }
  0x86   :  { %91 = vst.msk [vmem:[%s180_s3] sm:$0xff] %vm90_vm2, %v79_v16 }
  0x87   :  { %92 = vst.msk [vmem:[%s180_s3 + $0x8] sm:$0xff] %vm90_vm2, %v82_v17 }
  0x8a   :  { %v84_v19 = vpop.f32.mrf.mxu2  ;;  %v87_v20 = vpop.f32.mrf.mxu3 }
  0x8b   :  { %v85_v21 = vadd.f32 %v84_v19, %v37_v12  ;;  %v88_v22 = vadd.f32 %v87_v20, %v42_v18 }
  0x8d   :  { %93 = vst.msk [vmem:[%s180_s3 + $0x10] sm:$0xff] %vm90_vm2, %v85_v21 }
  0x8e   :  { %95 = vst.msk [vmem:[%s180_s3 + $0x18] sm:$0x1] %vm94_vm3, %v88_v22 }

</bundles_post_ra>
